<compile_context>
chip_gen: v5e
topology: v5e:2x2
jax: 0.10.0
libtpu: 0.0.40
codegen_flags: <defaults>
</compile_context>

<pallas_src>
import functools

import jax
import jax.numpy as jnp
from jax.experimental import pallas as pl
from jax.experimental.pallas import tpu as pltpu


def _patch_embed_kernel(p_ref, w_ref, b_ref, o_ref):
    # One (tm, K) patch tile x (K, tn) weight tile on the MXU, f32 accumulate,
    # f32 bias add on the VPU, cast on store.
    acc = jnp.dot(p_ref[...], w_ref[...], preferred_element_type=jnp.float32)
    o_ref[...] = (acc + b_ref[...]).astype(o_ref.dtype)


def _round_up(x, m):
    return ((x + m - 1) // m) * m


def _pick_tile(total, desired):
    """Largest multiple of 128 that divides `total` (itself a multiple of 128)
    and is <= `desired`.  Guarantees lane/sublane-aligned, evenly dividing
    tiles without extra padding."""
    best = 128
    t = 256
    limit = min(desired, total)
    while t <= limit:
        if total % t == 0:
            best = t
        t += 128
    return best


def _patch_matmul(patches, w, b, *, out_dtype, tm=256, tn=512):
    """(M, K) @ (K, N) + b via pallas_call, tiled over (M, N)."""
    M, K = patches.shape
    N = w.shape[1]

    Mp = _round_up(M, 128)
    Kp = _round_up(K, 128)
    Np = _round_up(N, 128)
    tm = _pick_tile(Mp, tm)
    tn = _pick_tile(Np, tn)

    if (Mp, Kp) != (M, K):
        patches = jnp.pad(patches, ((0, Mp - M), (0, Kp - K)))
    if (Kp, Np) != (K, N):
        w = jnp.pad(w, ((0, Kp - K), (0, Np - N)))
    if Np != N:
        b = jnp.pad(b, (0, Np - N))
    b = b.reshape(1, Np).astype(jnp.float32)

    grid = (Mp // tm, Np // tn)
    cost = pl.CostEstimate(
        flops=2 * Mp * Kp * Np,
        transcendentals=0,
        bytes_accessed=(Mp * Kp * patches.dtype.itemsize
                        + grid[0] * Kp * Np * w.dtype.itemsize
                        + Mp * Np * jnp.dtype(out_dtype).itemsize
                        + Np * 4),
    )

    out = pl.pallas_call(
        _patch_embed_kernel,
        out_shape=jax.ShapeDtypeStruct((Mp, Np), out_dtype),
        grid_spec=pltpu.PrefetchScalarGridSpec(
            num_scalar_prefetch=0,
            grid=grid,
            in_specs=[
                # Patch tile: constant over the (inner) N axis -> fetched once
                # per M tile by the pipeline.
                pl.BlockSpec((tm, Kp), lambda i, j: (i, 0)),
                # Weight / bias tiles: constant over the M axis -> reused.
                pl.BlockSpec((Kp, tn), lambda i, j: (0, j)),
                pl.BlockSpec((1, tn), lambda i, j: (0, j)),
            ],
            out_specs=pl.BlockSpec((tm, tn), lambda i, j: (i, j)),
        ),
        compiler_params=pltpu.CompilerParams(
            dimension_semantics=("parallel", "parallel"),
            vmem_limit_bytes=64 * 1024 * 1024),
        cost_estimate=cost,
    )(patches, w, b)
    return out[:M, :N]


def patch_embed_forward(x, weight, bias, patch_size, *,
                        compute_dtype=jnp.bfloat16, tm=256, tn=512):
    """x: (B, C, H, W) NCHW; weight: (embed_dims, C, ph, pw) (PyTorch OIHW);
    bias: (embed_dims,). Returns (B, embed_dims, DH, DW) in x.dtype."""
    ph, pw = patch_size
    B, C, H, W = x.shape
    E = weight.shape[0]
    out_dtype = x.dtype

    # pad_to_patch_size=True: zero-pad bottom of H, right of W.
    pad_h = (-H) % ph
    pad_w = (-W) % pw
    if pad_h or pad_w:
        x = jnp.pad(x, ((0, 0), (0, 0), (0, pad_h), (0, pad_w)))
    Hp, Wp = H + pad_h, W + pad_w
    DH, DW = Hp // ph, Wp // pw

    # Cast to the MXU-native compute dtype *before* the im2col shuffle so the
    # extra HBM round trip moves half the bytes.
    x = x.astype(compute_dtype)
    # PyTorch conv weight (E, C, ph, pw) flattened over (C, ph, pw) -> (K, E).
    w_mat = weight.reshape(E, C * ph * pw).T.astype(compute_dtype)

    # im2col for non-overlapping patches: (B, C, DH, ph, DW, pw)
    #   -> (B, DH, DW, C, ph, pw) -> (B*DH*DW, C*ph*pw)
    patches = x.reshape(B, C, DH, ph, DW, pw)
    patches = jnp.transpose(patches, (0, 2, 4, 1, 3, 5))
    patches = patches.reshape(B * DH * DW, C * ph * pw)

    out = _patch_matmul(patches, w_mat, bias.astype(jnp.float32),
                        out_dtype=out_dtype, tm=tm, tn=tn)   # (B*DH*DW, E)

    out = out.reshape(B, DH, DW, E)                          # free reshape
    # NCHW output is part of the module contract ('b (h w) c -> b c h w');
    # consumers wanting token-major (B, DH*DW, E) can take `out` pre-transpose.
    out = jnp.transpose(out, (0, 3, 1, 2))
    return out


if __name__ == "__main__":
    key = jax.random.PRNGKey(0)
    k_x, k_w, k_b = jax.random.split(key, 3)

    # Small shapes consistent with the module.
    B, C, H, W = 2, 4, 14, 13           # H, W not multiples of patch -> padding path
    embed_dims = 32
    patch = (8, 8)                      # kernel_size == stride == patch_size

    x = jax.random.normal(k_x, (B, C, H, W), dtype=jnp.float32)
    weight = jax.random.normal(
        k_w, (embed_dims, C, patch[0], patch[1]), dtype=jnp.float32) * 0.02
    bias = jax.random.normal(k_b, (embed_dims,), dtype=jnp.float32) * 0.02

    fwd = jax.jit(functools.partial(patch_embed_forward, patch_size=patch))
    out = fwd(x, weight, bias)
    jax.block_until_ready(out)

    # Cross-check against a plain-JAX f32 conv reference (same semantics);
    # tolerance covers the bf16 operand cast inside the kernel.
    x_pad = jnp.pad(x, ((0, 0), (0, 0), (0, (-H) % patch[0]), (0, (-W) % patch[1])))
    ref = jax.lax.conv_general_dilated(
        x_pad, weight, window_strides=patch, padding="VALID",
        dimension_numbers=("NCHW", "OIHW", "NCHW")) + bias.reshape(1, -1, 1, 1)
    assert out.shape == ref.shape
    assert jnp.allclose(out, ref, rtol=2e-2, atol=2e-2)

    print("KERNEL_OK")
</pallas_src>

<mosaic_0001>
module attributes {stable_mosaic.version = 11 : i64} {
  func.func @_patch_embed_kernel(%arg0: i32, %arg1: i32, %arg2: memref<128x256xbf16, #tpu.memory_space<vmem>>, %arg3: memref<256x128xbf16, #tpu.memory_space<vmem>>, %arg4: memref<1x128xf32, #tpu.memory_space<vmem>>, %arg5: memref<128x128xf32, #tpu.memory_space<vmem>>) attributes {dimension_semantics = [#tpu.dimension_semantics<parallel>, #tpu.dimension_semantics<parallel>], iteration_bounds = array<i64: 1, 1>, scalar_prefetch = 0 : i64, scratch_operands = 0 : i64, tpu.core_type = #tpu.core_type<tc>, window_params = [{transform_indices = @transform_0, window_bounds = array<i64: 128, 256>}, {transform_indices = @transform_1, window_bounds = array<i64: 256, 128>}, {transform_indices = @transform_2, window_bounds = array<i64: 1, 128>}, {transform_indices = @transform_3, window_bounds = array<i64: 128, 128>}]} {
    %c0 = arith.constant 0 : index
    %c0_0 = arith.constant 0 : index
    %0 = vector.load %arg2[%c0, %c0_0] : memref<128x256xbf16, #tpu.memory_space<vmem>>, vector<128x256xbf16>
    %c0_1 = arith.constant 0 : index
    %c0_2 = arith.constant 0 : index
    %1 = vector.load %arg3[%c0_1, %c0_2] : memref<256x128xbf16, #tpu.memory_space<vmem>>, vector<256x128xbf16>
    %cst = arith.constant dense<0.000000e+00> : vector<128x128xf32>
    %2 = tpu.matmul %0, %1, %cst {dimension_numbers = #tpu.dot_dimension_numbers<[1], [0], [0], [1], [0, 0, 1, 1], [], []>} : vector<128x256xbf16>, vector<256x128xbf16>, vector<128x128xf32> -> vector<128x128xf32>
    %c0_3 = arith.constant 0 : index
    %c0_4 = arith.constant 0 : index
    %3 = vector.load %arg4[%c0_3, %c0_4] : memref<1x128xf32, #tpu.memory_space<vmem>>, vector<1x128xf32>
    %4 = vector.broadcast %3 : vector<1x128xf32> to vector<128x128xf32>
    %5 = arith.addf %2, %4 : vector<128x128xf32>
    %c0_5 = arith.constant 0 : index
    %c0_6 = arith.constant 0 : index
    %6 = vector.load %arg5[%c0_5, %c0_6] : memref<128x128xf32, #tpu.memory_space<vmem>>, vector<128x128xf32>
    tpu.vector_store %arg5[%c0_5, %c0_6], %5 {strides = array<i32>} : memref<128x128xf32, #tpu.memory_space<vmem>>, vector<128x128xf32>,
    return
  }
  func.func @transform_0(%arg0: i32, %arg1: i32) -> (i32, i32) {
    %c0_i32 = arith.constant 0 : i32
    %c0_i32_0 = arith.constant 0 : i32
    return %arg0, %c0_i32 : i32, i32
  }
  func.func @transform_1(%arg0: i32, %arg1: i32) -> (i32, i32) {
    %c0_i32 = arith.constant 0 : i32
    %c0_i32_0 = arith.constant 0 : i32
    return %c0_i32, %arg1 : i32, i32
  }
  func.func @transform_2(%arg0: i32, %arg1: i32) -> (i32, i32) {
    %c0_i32 = arith.constant 0 : i32
    %c0_i32_0 = arith.constant 0 : i32
    return %c0_i32, %arg1 : i32, i32
  }
  func.func @transform_3(%arg0: i32, %arg1: i32) -> (i32, i32) {
    %c0_i32 = arith.constant 0 : i32
    return %arg0, %arg1 : i32, i32
  }
}

</mosaic_0001>

<bundles_post_ra>
// kernel: patch_embed_forward.1
= control target key start
LH: loop header
LB: loop body
LE: loop exit
PB: predicated region body
PF: predicated region fallthrough
CT: control target
= control target key end

     0   :  { %s770_s1 = inlined_call_operand.vmem [shape: bf16[256,128], index: 1, kind: input, shape index: {}]   ;;  %s771_s2 = inlined_call_operand.vmem [shape: f32[1,128], index: 2, kind: input, shape index: {}]   ;;  %s772_s0 = inlined_call_operand.vmem [shape: bf16[128,256], index: 0, kind: input, shape index: {}]   ;;  %s773_s3 = inlined_call_operand.vmem [shape: f32[128,128], index: 3, kind: output, shape index: {}]  }
   0x1   :  { %v511_v0 = vld [vmem:[%s770_s1 + $0x38] sm:$0xff]  ;;  %v510_v2 = vld [vmem:[%s770_s1 + $0x30] sm:$0xff]  ;;  %v509_v4 = vld [vmem:[%s770_s1 + $0x28] sm:$0xff] }
   0x2   :  { %v519_v1 = vld [vmem:[%s770_s1 + $0x78] sm:$0xff]  ;;  %242 = vmatpush.bf16.msra.mxu0 %v511_v0  ;;  %520 = vmatpush.bf16.msra.mxu2 %v511_v0  ;;  %v518_v3 = vld [vmem:[%s770_s1 + $0x70] sm:$0xff]  ;;  %v517_v5 = vld [vmem:[%s770_s1 + $0x68] sm:$0xff] }
   0x3   :  { %291 = vmatpush.bf16.msra.mxu1 %v519_v1  ;;  %528 = vmatpush.bf16.msra.mxu3 %v519_v1  ;;  %v508_v6 = vld [vmem:[%s770_s1 + $0x20] sm:$0xff]  ;;  %v507_v8 = vld [vmem:[%s770_s1 + $0x18] sm:$0xff]  ;;  %v506_v10 = vld [vmem:[%s770_s1 + $0x10] sm:$0xff] }
   0x4   :  { %v516_v7 = vld [vmem:[%s770_s1 + $0x60] sm:$0xff]  ;;  %v515_v9 = vld [vmem:[%s770_s1 + $0x58] sm:$0xff]  ;;  %v514_v11 = vld [vmem:[%s770_s1 + $0x50] sm:$0xff] }
   0x5   :  { %v505_v12 = vld [vmem:[%s770_s1 + $0x8] sm:$0xff]  ;;  %v504_v14 = vld [vmem:[%s770_s1] sm:$0xff]  ;;  %v370_v28 = vld [vmem:[%s772_s0 + $0x10] sm:$0xf] }
   0x6   :  { %243 = vmatpush.bf16.msra.mxu0 %v510_v2  ;;  %521 = vmatpush.bf16.msra.mxu2 %v510_v2  ;;  %v513_v13 = vld [vmem:[%s770_s1 + $0x48] sm:$0xff]  ;;  %v512_v15 = vld [vmem:[%s770_s1 + $0x40] sm:$0xff]  ;;  %v491_v29 = vld [vmem:[%s772_s0 + $0x14] sm:$0xf0] }
   0x7   :  { %292 = vmatpush.bf16.msra.mxu1 %v518_v3  ;;  %529 = vmatpush.bf16.msra.mxu3 %v518_v3  ;;  %v362_v16 = vld [vmem:[%s772_s0] sm:$0xf]  ;;  %v489_v17 = vld [vmem:[%s772_s0 + $0x4] sm:$0xf0]  ;;  %v488_v20 = vld [vmem:[%s772_s0 + $0x4] sm:$0xf]  ;;  %v371_v36 = vor.u32 %v491_v29, %v370_v28 }
   0x8   :  { %v394_v18 = vld [vmem:[%s772_s0 + $0x40] sm:$0xf]  ;;  %v497_v19 = vld [vmem:[%s772_s0 + $0x44] sm:$0xf0]  ;;  %v364_v21 = vld [vmem:[%s772_s0 + $0x8] sm:$0xf0]  ;;  %v363_v24 = vor.u32 %v489_v17, %v362_v16 }
   0x9   :  { %v496_v22 = vld [vmem:[%s772_s0 + $0x44] sm:$0xf]  ;;  %v396_v23 = vld [vmem:[%s772_s0 + $0x48] sm:$0xf0]  ;;  %v395_v25 = vor.u32 %v497_v19, %v394_v18  ;;  %v367_v26 = vor.u32 %v488_v20, %v364_v21  ;;  %v402_v30 = vld [vmem:[%s772_s0 + $0x50] sm:$0xf] }
   0xa   :  { %244 = vmatpush.bf16.msra.mxu0 %v509_v4  ;;  %522 = vmatpush.bf16.msra.mxu2 %v509_v4  ;;  %v399_v27 = vor.u32 %v496_v22, %v396_v23  ;;  %v499_v31 = vld [vmem:[%s772_s0 + $0x54] sm:$0xf0]  ;;  %v490_v32 = vld [vmem:[%s772_s0 + $0x14] sm:$0xf]  ;;  %v372_v33 = vld [vmem:[%s772_s0 + $0x18] sm:$0xf0] }
   0xb   :  { %293 = vmatpush.bf16.msra.mxu1 %v517_v5  ;;  %530 = vmatpush.bf16.msra.mxu3 %v517_v5  ;;  %v498_v34 = vld [vmem:[%s772_s0 + $0x54] sm:$0xf]  ;;  %v404_v35 = vld [vmem:[%s772_s0 + $0x58] sm:$0xf0]  ;;  %v403_v37 = vor.u32 %v499_v31, %v402_v30  ;;  %v375_v38 = vor.u32 %v490_v32, %v372_v33  ;;  %v378_v40 = vld [vmem:[%s772_s0 + $0x20] sm:$0xf] }
   0xc   :  { %v407_v39 = vor.u32 %v498_v34, %v404_v35  ;;  %v493_v41 = vld [vmem:[%s772_s0 + $0x24] sm:$0xf0]  ;;  %v410_v42 = vld [vmem:[%s772_s0 + $0x60] sm:$0xf]  ;;  %v492_v44 = vld [vmem:[%s772_s0 + $0x24] sm:$0xf] }
   0xd   :  { %v501_v43 = vld [vmem:[%s772_s0 + $0x64] sm:$0xf0]  ;;  %v380_v45 = vld [vmem:[%s772_s0 + $0x28] sm:$0xf0]  ;;  %v500_v46 = vld [vmem:[%s772_s0 + $0x64] sm:$0xf]  ;;  %v379_v48 = vor.u32 %v493_v41, %v378_v40 }
   0xe   :  { %245 = vmatpush.bf16.msra.mxu0 %v508_v6  ;;  %523 = vmatpush.bf16.msra.mxu2 %v508_v6  ;;  %v412_v47 = vld [vmem:[%s772_s0 + $0x68] sm:$0xf0]  ;;  %v411_v49 = vor.u32 %v501_v43, %v410_v42  ;;  %v383_v50 = vor.u32 %v492_v44, %v380_v45  ;;  %v386_v52 = vld [vmem:[%s772_s0 + $0x30] sm:$0xf]  ;;  %v495_v53 = vld [vmem:[%s772_s0 + $0x34] sm:$0xf0] }
   0xf   :  { %294 = vmatpush.bf16.msra.mxu1 %v516_v7  ;;  %531 = vmatpush.bf16.msra.mxu3 %v516_v7  ;;  %v415_v51 = vor.u32 %v500_v46, %v412_v47  ;;  %v418_v54 = vld [vmem:[%s772_s0 + $0x70] sm:$0xf]  ;;  %v503_v55 = vld [vmem:[%s772_s0 + $0x74] sm:$0xf0]  ;;  %v494_v56 = vld [vmem:[%s772_s0 + $0x34] sm:$0xf]  ;;  %v387_v60 = vor.u32 %v495_v53, %v386_v52 }
  0x10   :  { %v388_v57 = vld [vmem:[%s772_s0 + $0x38] sm:$0xf0]  ;;  %v502_v58 = vld [vmem:[%s772_s0 + $0x74] sm:$0xf]  ;;  %v419_v61 = vor.u32 %v503_v55, %v418_v54  ;;  %v704_v0 = vld [vmem:[%s771_s2] ss:$0 sm:$0xff] }
  0x11   :  { %v420_v59 = vld [vmem:[%s772_s0 + $0x78] sm:$0xf0]  ;;  %v391_v62 = vor.u32 %v494_v56, %v388_v57 }
  0x12   :  { %246 = vmatpush.bf16.msra.mxu0 %v507_v8  ;;  %524 = vmatpush.bf16.msra.mxu2 %v507_v8  ;;  %v423_v63 = vor.u32 %v502_v58, %v420_v59 }
  0x13   :  { %295 = vmatpush.bf16.msra.mxu1 %v515_v9  ;;  %532 = vmatpush.bf16.msra.mxu3 %v515_v9 }
  0x16   :  { %247 = vmatpush.bf16.msra.mxu0 %v506_v10  ;;  %525 = vmatpush.bf16.msra.mxu2 %v506_v10 }
  0x17   :  { %296 = vmatpush.bf16.msra.mxu1 %v514_v11  ;;  %533 = vmatpush.bf16.msra.mxu3 %v514_v11 }
  0x1a   :  { %248 = vmatpush.bf16.msra.mxu0 %v505_v12  ;;  %526 = vmatpush.bf16.msra.mxu2 %v505_v12 }
  0x1b   :  { %297 = vmatpush.bf16.msra.mxu1 %v513_v13  ;;  %534 = vmatpush.bf16.msra.mxu3 %v513_v13 }
  0x1e   :  { %249 = vmatpush.bf16.msra.mxu0 %v504_v14  ;;  %527 = vmatpush.bf16.msra.mxu2 %v504_v14 }
  0x1f   :  { %298 = vmatpush.bf16.msra.mxu1 %v512_v15  ;;  %535 = vmatpush.bf16.msra.mxu3 %v512_v15 }
  0x21   :  { %250 = vmatmul.bf16.vlgmr.msra.gmra.mxu0 %v363_v24  ;;  %270 = vmatmul.bf16.vlgmr.msra.gmra.mxu2 %v395_v25 }
  0x22   :  { %299 = vmatmul.bf16.vlgmr.msra.gmra.mxu1 %v367_v26  ;;  %319 = vmatmul.bf16.vlgmr.msra.gmra.mxu3 %v399_v27 }
  0x31   :  { %255 = vmatmul.bf16.gmra.mxu0 %v371_v36  ;;  %275 = vmatmul.bf16.gmra.mxu2 %v403_v37 }
  0x32   :  { %304 = vmatmul.bf16.gmra.mxu1 %v375_v38  ;;  %324 = vmatmul.bf16.gmra.mxu3 %v407_v39 }
  0x41   :  { %260 = vmatmul.bf16.gmra.mxu0 %v379_v48  ;;  %280 = vmatmul.bf16.gmra.mxu2 %v411_v49 }
  0x42   :  { %309 = vmatmul.bf16.gmra.mxu1 %v383_v50  ;;  %329 = vmatmul.bf16.gmra.mxu3 %v415_v51 }
  0x51   :  { %265 = vmatmul.bf16.gmra.mxu0 %v387_v60  ;;  %285 = vmatmul.bf16.gmra.mxu2 %v419_v61 }
  0x52   :  { %314 = vmatmul.bf16.gmra.mxu1 %v391_v62  ;;  %334 = vmatmul.bf16.gmra.mxu3 %v423_v63 }
  0x9e   :  { %v251_v1 = vpop.f32.mrf.mxu0 }
  0x9f   :  { %v252_v2 = vadd.f32 %v704_v0, %v251_v1  ;;  %v300_v3 = vpop.f32.mrf.mxu1 }
  0xa1   :  { %v301_v4 = vadd.f32 %v300_v3, %v252_v2 }
  0xa3   :  { %340 = vst [vmem:[%s773_s3] sm:$0xff] %v301_v4 }
  0xa4   :  { %v271_v5 = vpop.f32.mrf.mxu2 }
  0xa5   :  { %v272_v6 = vadd.f32 %v704_v0, %v271_v5  ;;  %v320_v7 = vpop.f32.mrf.mxu3 }
  0xa6   :  { %v253_v8 = vpop.f32.mrf.mxu0 }
  0xa7   :  { %v321_v9 = vadd.f32 %v320_v7, %v272_v6  ;;  %v254_v10 = vadd.f32 %v704_v0, %v253_v8  ;;  %v302_v11 = vpop.f32.mrf.mxu1 }
  0xa9   :  { %348 = vst [vmem:[%s773_s3 + $0x40] sm:$0xff] %v321_v9  ;;  %v303_v12 = vadd.f32 %v302_v11, %v254_v10 }
  0xab   :  { %341 = vst [vmem:[%s773_s3 + $0x8] sm:$0xff] %v303_v12 }
  0xac   :  { %v273_v13 = vpop.f32.mrf.mxu2 }
  0xad   :  { %v274_v14 = vadd.f32 %v704_v0, %v273_v13  ;;  %v322_v15 = vpop.f32.mrf.mxu3 }
  0xae   :  { %v256_v16 = vpop.f32.mrf.mxu0 }
  0xaf   :  { %v323_v17 = vadd.f32 %v322_v15, %v274_v14  ;;  %v257_v18 = vadd.f32 %v704_v0, %v256_v16  ;;  %v305_v19 = vpop.f32.mrf.mxu1 }
  0xb1   :  { %349 = vst [vmem:[%s773_s3 + $0x48] sm:$0xff] %v323_v17  ;;  %v306_v20 = vadd.f32 %v305_v19, %v257_v18 }
  0xb3   :  { %342 = vst [vmem:[%s773_s3 + $0x10] sm:$0xff] %v306_v20 }
  0xb4   :  { %v276_v21 = vpop.f32.mrf.mxu2 }
  0xb5   :  { %v277_v22 = vadd.f32 %v704_v0, %v276_v21  ;;  %v325_v23 = vpop.f32.mrf.mxu3 }
  0xb6   :  { %v258_v24 = vpop.f32.mrf.mxu0 }
  0xb7   :  { %v326_v25 = vadd.f32 %v325_v23, %v277_v22  ;;  %v259_v26 = vadd.f32 %v704_v0, %v258_v24  ;;  %v307_v27 = vpop.f32.mrf.mxu1 }
  0xb9   :  { %350 = vst [vmem:[%s773_s3 + $0x50] sm:$0xff] %v326_v25  ;;  %v308_v28 = vadd.f32 %v307_v27, %v259_v26 }
  0xbb   :  { %343 = vst [vmem:[%s773_s3 + $0x18] sm:$0xff] %v308_v28 }
  0xbc   :  { %v278_v29 = vpop.f32.mrf.mxu2 }
  0xbd   :  { %v279_v30 = vadd.f32 %v704_v0, %v278_v29  ;;  %v327_v31 = vpop.f32.mrf.mxu3 }
  0xbe   :  { %v261_v32 = vpop.f32.mrf.mxu0 }
  0xbf   :  { %v328_v33 = vadd.f32 %v327_v31, %v279_v30  ;;  %v262_v34 = vadd.f32 %v704_v0, %v261_v32  ;;  %v310_v35 = vpop.f32.mrf.mxu1 }
  0xc1   :  { %351 = vst [vmem:[%s773_s3 + $0x58] sm:$0xff] %v328_v33  ;;  %v311_v36 = vadd.f32 %v310_v35, %v262_v34 }
  0xc3   :  { %344 = vst [vmem:[%s773_s3 + $0x20] sm:$0xff] %v311_v36 }
  0xc4   :  { %v281_v37 = vpop.f32.mrf.mxu2 }
  0xc5   :  { %v282_v38 = vadd.f32 %v704_v0, %v281_v37  ;;  %v330_v39 = vpop.f32.mrf.mxu3 }
  0xc6   :  { %v263_v40 = vpop.f32.mrf.mxu0 }
  0xc7   :  { %v331_v41 = vadd.f32 %v330_v39, %v282_v38  ;;  %v264_v42 = vadd.f32 %v704_v0, %v263_v40  ;;  %v312_v43 = vpop.f32.mrf.mxu1 }
  0xc9   :  { %352 = vst [vmem:[%s773_s3 + $0x60] sm:$0xff] %v331_v41  ;;  %v313_v44 = vadd.f32 %v312_v43, %v264_v42 }
  0xcb   :  { %345 = vst [vmem:[%s773_s3 + $0x28] sm:$0xff] %v313_v44 }
  0xcc   :  { %v283_v45 = vpop.f32.mrf.mxu2 }
  0xcd   :  { %v284_v46 = vadd.f32 %v704_v0, %v283_v45  ;;  %v332_v47 = vpop.f32.mrf.mxu3 }
  0xce   :  { %v266_v48 = vpop.f32.mrf.mxu0 }
  0xcf   :  { %v333_v49 = vadd.f32 %v332_v47, %v284_v46  ;;  %v267_v50 = vadd.f32 %v704_v0, %v266_v48  ;;  %v315_v51 = vpop.f32.mrf.mxu1 }
  0xd1   :  { %353 = vst [vmem:[%s773_s3 + $0x68] sm:$0xff] %v333_v49  ;;  %v316_v52 = vadd.f32 %v315_v51, %v267_v50 }
  0xd3   :  { %346 = vst [vmem:[%s773_s3 + $0x30] sm:$0xff] %v316_v52 }
  0xd4   :  { %v286_v53 = vpop.f32.mrf.mxu2 }
  0xd5   :  { %v287_v54 = vadd.f32 %v704_v0, %v286_v53  ;;  %v335_v55 = vpop.f32.mrf.mxu3 }
  0xd6   :  { %v268_v56 = vpop.f32.mrf.mxu0 }
  0xd7   :  { %v336_v57 = vadd.f32 %v335_v55, %v287_v54  ;;  %v269_v58 = vadd.f32 %v704_v0, %v268_v56  ;;  %v317_v59 = vpop.f32.mrf.mxu1 }
  0xd9   :  { %354 = vst [vmem:[%s773_s3 + $0x70] sm:$0xff] %v336_v57  ;;  %v318_v60 = vadd.f32 %v317_v59, %v269_v58 }
  0xdb   :  { %347 = vst [vmem:[%s773_s3 + $0x38] sm:$0xff] %v318_v60 }
  0xdc   :  { %v288_v61 = vpop.f32.mrf.mxu2 }
  0xdd   :  { %v289_v62 = vadd.f32 %v704_v0, %v288_v61  ;;  %v337_v63 = vpop.f32.mrf.mxu3 }
  0xdf   :  { %v338_v1 = vadd.f32 %v337_v63, %v289_v62 }
  0xe1   :  { %355 = vst [vmem:[%s773_s3 + $0x78] sm:$0xff] %v338_v1 }

</bundles_post_ra>
